<compile_context>
chip_gen: v7x
topology: tpu7x:2x2x1
jax: 0.10.0
libtpu: 0.0.40
codegen_flags: <defaults>
</compile_context>

<pallas_src>
import functools

import jax
import jax.numpy as jnp
from jax.experimental import pallas as pl
from jax.experimental.pallas import tpu as pltpu

_LANE = 128      # TPU lane width (last dim of a vreg)
_SUBLANE = 8     # f32 sublane count (second-to-last dim of a vreg)


def _round_up(x, m):
    return (x + m - 1) // m * m


def _cdiv(a, b):
    return -(-a // b)


def _pick_batch_tile(b, cap):
    """Sublane-aligned batch tile that minimizes padding for b rows."""
    b_sub = _round_up(max(b, 1), _SUBLANE)
    tb = min(cap, b_sub)
    ntiles = _cdiv(b_sub, tb)
    tb = _round_up(_cdiv(b_sub, ntiles), _SUBLANE)
    return tb, tb * ntiles


def _resident_table_bytes_limit():
    """Generation-aware cutoff for keeping the embedding table resident in VMEM."""
    try:
        vmem = pltpu.get_tpu_info().vmem_capacity_bytes
    except Exception:
        vmem = 64 << 20            # conservative v7x-sized fallback
    return vmem // 8               # leave headroom for I/O double-buffers


# ---------------------------------------------------------------- kernels ----

def _linear_kernel(x_ref, wt_ref, b_ref, o_ref):
    # o = x @ W^T + b.  W^T pre-transposed + lane-padded at init.
    #   x_ref : (TB, label_dim)   wt_ref : (label_dim, LN)   b_ref : (1, LN)
    o_ref[...] = (
        jnp.dot(x_ref[...], wt_ref[...], preferred_element_type=jnp.float32)
        + b_ref[...]
    ).astype(o_ref.dtype)


def _embed_resident_kernel(idx_ref, table_ref, o_ref, *, num_classes):
    # Small-table fast path: whole table resident in VMEM, in-VMEM one-hot
    # gather on the MXU.  idx_ref: (TB, 1) i32, table_ref: (C, LN), o: (TB, LN).
    idx = jnp.clip(idx_ref[...], 0, num_classes - 1)          # clamp in-kernel
    tb = idx.shape[0]
    cls = jax.lax.broadcasted_iota(jnp.int32, (tb, table_ref.shape[0]), 1)
    onehot = (cls == idx).astype(jnp.float32)                 # (TB, C)
    o_ref[...] = jnp.dot(onehot, table_ref[...],
                         preferred_element_type=jnp.float32).astype(o_ref.dtype)


def _embed_gather_kernel(idx_ref, table_hbm, o_ref, buf, sem, *, group,
                         num_classes):
    # Large-table path: G data-dependent row DMAs HBM -> VMEM scratch per
    # grid step (start all, then wait), then one dense (G, LN) store.
    base = pl.program_id(0) * group
    rows = [jnp.clip(idx_ref[base + r], 0, num_classes - 1)   # scalar clamps
            for r in range(group)]
    for r in range(group):
        pltpu.make_async_copy(table_hbm.at[pl.ds(rows[r], 1), :],
                              buf.at[pl.ds(r, 1), :],
                              sem.at[r]).start()
    for r in range(group):
        pltpu.make_async_copy(table_hbm.at[pl.ds(0, 1), :],
                              buf.at[pl.ds(r, 1), :],
                              sem.at[r]).wait()
    o_ref[...] = buf[...]


# --------------------------------------------------------------- wrappers ----

def linear_label_mapping(labels, w_t_pad, b_pad, latent_dim):
    """labels: (B, label_dim) f32.  w_t_pad: (label_dim, LN).  b_pad: (1, LN)."""
    B, label_dim = labels.shape
    LN = w_t_pad.shape[1]

    TB, B_pad = _pick_batch_tile(B, 512)      # big tiles, minimal padding
    x = labels if B_pad == B else jnp.pad(labels, ((0, B_pad - B), (0, 0)))

    # TODO(synk): for very large label_dim*LN, tile LN as a second grid axis
    # (or raise vmem_limit_bytes) to stay inside v7x's 64 MiB VMEM.
    out = pl.pallas_call(
        _linear_kernel,
        out_shape=jax.ShapeDtypeStruct((B_pad, LN), jnp.float32),
        grid=(B_pad // TB,),
        in_specs=[
            pl.BlockSpec((TB, label_dim), lambda i: (i, 0)),   # batch tile
            pl.BlockSpec((label_dim, LN), lambda i: (0, 0)),   # resident RHS
            pl.BlockSpec((1, LN), lambda i: (0, 0)),           # resident bias
        ],
        out_specs=pl.BlockSpec((TB, LN), lambda i: (i, 0)),
        compiler_params=pltpu.CompilerParams(
            dimension_semantics=("parallel",)),
    )(x, w_t_pad, b_pad)

    if B_pad != B:
        out = out[:B]
    return out[:, :latent_dim] if LN != latent_dim else out


def embedding_label_mapping(labels_int, table_pad, latent_dim, path=None):
    """labels_int: (B,) int.  table_pad: (num_classes, LN) f32 (lane-padded)."""
    B = labels_int.shape[0]
    num_classes, LN = table_pad.shape
    idx = labels_int.astype(jnp.int32)

    if path is None:
        table_bytes = num_classes * LN * 4
        resident = (table_bytes <= _resident_table_bytes_limit()
                    and num_classes <= 4096)
        path = "resident" if resident else "gather"

    if path == "resident":
        TB, B_pad = _pick_batch_tile(B, 128)
        if B_pad != B:
            idx = jnp.pad(idx, (0, B_pad - B))
        idx2 = idx.reshape(B_pad, 1)
        out = pl.pallas_call(
            functools.partial(_embed_resident_kernel, num_classes=num_classes),
            out_shape=jax.ShapeDtypeStruct((B_pad, LN), jnp.float32),
            grid=(B_pad // TB,),
            in_specs=[
                pl.BlockSpec((TB, 1), lambda i: (i, 0)),               # indices
                pl.BlockSpec((num_classes, LN), lambda i: (0, 0)),     # table
            ],
            out_specs=pl.BlockSpec((TB, LN), lambda i: (i, 0)),
            compiler_params=pltpu.CompilerParams(
                dimension_semantics=("parallel",)),
        )(idx2, table_pad)
    else:
        G = 8                                   # rows gathered per grid step
        B_pad = _round_up(B, G)
        if B_pad != B:
            idx = jnp.pad(idx, (0, B_pad - B))
        out = pl.pallas_call(
            functools.partial(_embed_gather_kernel, group=G,
                              num_classes=num_classes),
            out_shape=jax.ShapeDtypeStruct((B_pad, LN), jnp.float32),
            grid_spec=pltpu.PrefetchScalarGridSpec(
                num_scalar_prefetch=1,          # indices land in SMEM
                grid=(B_pad // G,),
                in_specs=[pl.BlockSpec(memory_space=pl.ANY)],   # table in HBM
                out_specs=pl.BlockSpec((G, LN), lambda i, idx_ref: (i, 0)),
                scratch_shapes=[pltpu.VMEM((G, LN), jnp.float32),
                                pltpu.SemaphoreType.DMA((G,))],
            ),
            compiler_params=pltpu.CompilerParams(
                dimension_semantics=("parallel",)),
        )(idx, table_pad)

    if B_pad != B:
        out = out[:B]
    return out[:, :latent_dim] if LN != latent_dim else out


class LabelMapping:
    """JAX/Pallas port of Label_mapping. Deterministic synthetic init."""

    def __init__(self, one_hot: bool, label_dim: int, latent_dim: int,
                 num_classes: int = None, key=None):
        self.one_hot = one_hot
        self.label_dim = label_dim
        self.latent_dim = latent_dim
        self.lane_dim = _round_up(latent_dim, _LANE)   # lane-dense output width
        pad = self.lane_dim - latent_dim
        key = jax.random.PRNGKey(42) if key is None else key

        if one_hot:
            # nn.Linear(label_dim, latent_dim): weight (latent, label), bias (latent,)
            kw, kb = jax.random.split(key)
            bound = 1.0 / jnp.sqrt(label_dim)
            self.weight = jax.random.uniform(kw, (latent_dim, label_dim),
                                             jnp.float32, -bound, bound)
            self.bias = jax.random.uniform(kb, (latent_dim,),
                                           jnp.float32, -bound, bound)
            # Hoisted once: pre-transposed + lane-padded kernel parameters.
            self.w_t_pad = jnp.pad(self.weight.T, ((0, 0), (0, pad)))
            self.b_pad = jnp.pad(self.bias, (0, pad)).reshape(1, self.lane_dim)
            self.table = None
            self.table_pad = None
        else:
            # nn.Embedding(num_classes, latent_dim): weight ~ N(0, 1)
            assert num_classes is not None
            self.table = jax.random.normal(key, (num_classes, latent_dim),
                                           jnp.float32)
            # Hoisted once: lane-padded 2-D table (no singleton axis).
            self.table_pad = jnp.pad(self.table, ((0, 0), (0, pad)))
            self.weight = None
            self.bias = None
            self.w_t_pad = None
            self.b_pad = None

    def __call__(self, labels):
        if self.one_hot:
            return linear_label_mapping(labels, self.w_t_pad, self.b_pad,
                                        self.latent_dim)
        # TODO(synk): nn.Embedding raises on out-of-range indices; we clamp.
        return embedding_label_mapping(labels, self.table_pad, self.latent_dim)


# ------------------------------------------------------------------- main ----

if __name__ == "__main__":
    key = jax.random.PRNGKey(0)
    k1, k2, k3 = jax.random.split(key, 3)

    B, label_dim, latent_dim, num_classes = 8, 8, 32, 10

    # --- one_hot=True path (Linear) ---
    mod_lin = LabelMapping(one_hot=True, label_dim=label_dim,
                           latent_dim=latent_dim, key=k1)
    labels_f = jax.random.normal(k2, (B, label_dim), jnp.float32)
    out_lin = mod_lin(labels_f)
    jax.block_until_ready(out_lin)
    ref_lin = labels_f @ mod_lin.weight.T + mod_lin.bias
    assert out_lin.shape == (B, latent_dim)
    assert jnp.allclose(out_lin, ref_lin, atol=1e-5, rtol=1e-5)

    # --- one_hot=False path (Embedding), resident fast path (small table) ---
    mod_emb = LabelMapping(one_hot=False, label_dim=label_dim,
                           latent_dim=latent_dim, num_classes=num_classes,
                           key=k1)
    labels_i = jax.random.randint(k3, (B,), 0, num_classes, jnp.int32)
    ref_emb = mod_emb.table[labels_i]

    out_emb = mod_emb(labels_i)
    jax.block_until_ready(out_emb)
    assert out_emb.shape == (B, latent_dim)
    assert jnp.allclose(out_emb, ref_emb, atol=1e-5, rtol=1e-5)

    # --- also exercise the large-table HBM-gather path (forced) ---
    out_emb_g = embedding_label_mapping(labels_i, mod_emb.table_pad,
                                        latent_dim, path="gather")
    jax.block_until_ready(out_emb_g)
    assert out_emb_g.shape == (B, latent_dim)
    assert jnp.allclose(out_emb_g, ref_emb, atol=1e-5, rtol=1e-5)

    print("KERNEL_OK")
</pallas_src>

<mosaic_0001>
module attributes {stable_mosaic.version = 11 : i64} {
  func.func @_linear_kernel(%arg0: i32, %arg1: memref<8x8xf32, #tpu.memory_space<vmem>>, %arg2: memref<8x128xf32, #tpu.memory_space<vmem>>, %arg3: memref<1x128xf32, #tpu.memory_space<vmem>>, %arg4: memref<8x128xf32, #tpu.memory_space<vmem>>) attributes {dimension_semantics = [#tpu.dimension_semantics<parallel>], iteration_bounds = array<i64: 1>, scalar_prefetch = 0 : i64, scratch_operands = 0 : i64, tpu.core_type = #tpu.core_type<tc>, window_params = [{transform_indices = @transform_0, window_bounds = array<i64: 8, 8>}, {pipeline_mode = #tpu.pipeline_mode<synchronous>, transform_indices = @transform_1, window_bounds = array<i64: 8, 128>}, {pipeline_mode = #tpu.pipeline_mode<synchronous>, transform_indices = @transform_2, window_bounds = array<i64: 1, 128>}, {transform_indices = @transform_3, window_bounds = array<i64: 8, 128>}]} {
    %c0 = arith.constant 0 : index
    %c0_0 = arith.constant 0 : index
    %0 = vector.load %arg1[%c0, %c0_0] : memref<8x8xf32, #tpu.memory_space<vmem>>, vector<8x8xf32>
    %c0_1 = arith.constant 0 : index
    %c0_2 = arith.constant 0 : index
    %1 = vector.load %arg2[%c0_1, %c0_2] : memref<8x128xf32, #tpu.memory_space<vmem>>, vector<8x128xf32>
    %cst = arith.constant dense<0.000000e+00> : vector<8x128xf32>
    %2 = tpu.matmul %0, %1, %cst {dimension_numbers = #tpu.dot_dimension_numbers<[1], [0], [0], [1], [0, 0, 1, 1], [], []>} : vector<8x8xf32>, vector<8x128xf32>, vector<8x128xf32> -> vector<8x128xf32>
    %c0_3 = arith.constant 0 : index
    %c0_4 = arith.constant 0 : index
    %3 = vector.load %arg3[%c0_3, %c0_4] : memref<1x128xf32, #tpu.memory_space<vmem>>, vector<1x128xf32>
    %4 = vector.broadcast %3 : vector<1x128xf32> to vector<8x128xf32>
    %5 = arith.addf %2, %4 : vector<8x128xf32>
    %c0_5 = arith.constant 0 : index
    %c0_6 = arith.constant 0 : index
    %6 = vector.load %arg4[%c0_5, %c0_6] : memref<8x128xf32, #tpu.memory_space<vmem>>, vector<8x128xf32>
    tpu.vector_store %arg4[%c0_5, %c0_6], %5 {strides = array<i32>} : memref<8x128xf32, #tpu.memory_space<vmem>>, vector<8x128xf32>,
    return
  }
  func.func @transform_0(%arg0: i32) -> (i32, i32) {
    %c0_i32 = arith.constant 0 : i32
    %c0_i32_0 = arith.constant 0 : i32
    return %arg0, %c0_i32 : i32, i32
  }
  func.func @transform_1(%arg0: i32) -> (i32, i32) {
    %c0_i32 = arith.constant 0 : i32
    %c0_i32_0 = arith.constant 0 : i32
    %c0_i32_1 = arith.constant 0 : i32
    return %c0_i32, %c0_i32_0 : i32, i32
  }
  func.func @transform_2(%arg0: i32) -> (i32, i32) {
    %c0_i32 = arith.constant 0 : i32
    %c0_i32_0 = arith.constant 0 : i32
    %c0_i32_1 = arith.constant 0 : i32
    return %c0_i32, %c0_i32_0 : i32, i32
  }
  func.func @transform_3(%arg0: i32) -> (i32, i32) {
    %c0_i32 = arith.constant 0 : i32
    %c0_i32_0 = arith.constant 0 : i32
    return %arg0, %c0_i32 : i32, i32
  }
}

</mosaic_0001>

<bundles_post_ra>
// kernel: tpu_custom_call.1
= control target key start
LH: loop header
LB: loop body
LE: loop exit
PB: predicated region body
PF: predicated region fallthrough
CT: control target
= control target key end

     0   :  { %8 = vsyncpa [#allocation3], 0  ;;  %s289_s0 = inlined_call_operand.hbm [shape: f32[8,8], index: 0, kind: input, shape index: {}]   ;;  %s290_s1 = inlined_call_operand.hbm [shape: f32[8,128], index: 1, kind: input, shape index: {}]   ;;  %s291_s2 = inlined_call_operand.vmem [shape: f32[1,128], index: 2, kind: input, shape index: {}]   ;;  %s292_s3 = inlined_call_operand.hbm [shape: f32[8,128], index: 3, kind: output, shape index: {}]  }
   0x1   :  { %9 = vsyncpa [#allocation6], 0 }
   0x2   :  { %10 = vsyncpa [#allocation4], 0  ;;  %s225_s12 = smov [#allocation2]   ;;  %s226_s14 = smov [#allocation5]  }
   0x3   :  { %s17_s13 = sshll.u32 %s225_s12, 4  ;;  %s27_s15 = sshll.u32 %s226_s14, 4  ;;  %s18_s13 = int_to_ptr.vmem [resolvable:$true] %s17_s13  ;;  %s28_s15 = int_to_ptr.vmem [resolvable:$true] %s27_s15 }
   0x4   :  { %s153_s18 = scalar_lea.hbm %s289_s0, 128 }
   0x5   :  { %p154_p0 = scmp.ne.s32.totalorder %s289_s0, %s153_s18  ;;  %p157_p1 = scmp.lt.u32.totalorder %s153_s18, %s289_s0 }
   0x7   :  { %p159_p2 = pnand %p157_p1, %p154_p0 }
   0x9   :  { %162 = shalt.err (!%p159_p2)
}
   0xa   :  { %s163_s23 = scalar_lea.vmem %s18_s13, 128  ;;  %p168_p4 = scmp.lt.s32.totalorder %s18_s13, %s18_s13 }
   0xb   :  { %p164_p3 = scmp.ne.s32.totalorder %s18_s13, %s163_s23  ;;  %p169_p5 = scmp.lt.s32.totalorder %s163_s23, %s163_s23 }
   0xd   :  { %p170_p6 = por %p169_p5, %p168_p4 }
   0xf   :  { %p171_p7 = pnand %p170_p6, %p164_p3 }
  0x11   :  { %174 = shalt.err (!%p171_p7)
}
  0x12   :  { %20 = dma.hbm_to_vmem [thread:$0]  %s289_s0, 128, %s18_s13, [#allocation3]  }
  0x13   :  { %s175_s28 = scalar_lea.hbm %s290_s1, 128 }
  0x14   :  { %p176_p8 = scmp.ne.s32.totalorder %s290_s1, %s175_s28  ;;  %p179_p9 = scmp.lt.u32.totalorder %s175_s28, %s290_s1 }
  0x16   :  { %p181_p10 = pnand %p179_p9, %p176_p8 }
  0x18   :  { %184 = shalt.err (!%p181_p10)
}
  0x19   :  { %s185_s6 = scalar_lea.vmem %s28_s15, 128  ;;  %p190_p12 = scmp.lt.s32.totalorder %s28_s15, %s28_s15 }
  0x1a   :  { %p186_p11 = scmp.ne.s32.totalorder %s28_s15, %s185_s6  ;;  %p191_p13 = scmp.lt.s32.totalorder %s185_s6, %s185_s6 }
  0x1c   :  { %p192_p0 = por %p191_p13, %p190_p12 }
  0x1e   :  { %p193_p1 = pnand %p192_p0, %p186_p11 }
  0x20   :  { %196 = shalt.err (!%p193_p1)
}
  0x21   :  { %30 = dma.hbm_to_vmem [thread:$0]  %s290_s1, 128, %s28_s15, [#allocation6]  }
  0x22   :  { %219 = dma.done.wait [#allocation3], 128  }
  0x23   :  { %220 = vsyncadd [#allocation3], 4294967168 }
  0x24   :  { %221 = dma.done.wait [#allocation6], 128  }
  0x25   :  { %222 = vsyncadd [#allocation6], 4294967168  ;;  %v227_v0 = vmov 0.0   ;;  %vm228_vm0 = vmmov 0   ;;  %vm48_vm1 = vcmask 64512   ;;  %v40_v1 = vld [vmem:[#allocation5] sm:$0xff] }
  0x26   :  { %143 = vmatprep.subr.mxu0 %v227_v0  ;;  %145 = vmatprep.mubr.msk.f32.mxu0 %vm228_vm0, %v227_v0  ;;  %v39_v2 = vld [vmem:[#allocation2] sm:$0xff]  ;;  %s229_s10 = smov [#allocation7]  }
  0x27   :  { %144 = vmatpush3.msra.mxu0 %v40_v1  ;;  %v139_v3 = vld [vmem:[%s291_s2] ss:$0 sm:$0xff]  ;;  %s129_s11 = sshll.u32 %s229_s10, 4  ;;  %s130_s11 = int_to_ptr.vmem [resolvable:$true] %s129_s11 }
  0x28   :  { %146 = vmatmul.mubr.msk.f32.vlgmr.msra.gmra.mrb[0].mxu0 %vm48_vm1, %v39_v2  ;;  %s197_s1 = scalar_lea.vmem %s130_s11, 128  ;;  %p202_p3 = scmp.lt.s32.totalorder %s130_s11, %s130_s11 }
  0x29   :  { %p198_p2 = scmp.ne.s32.totalorder %s130_s11, %s197_s1  ;;  %p203_p4 = scmp.lt.s32.totalorder %s197_s1, %s197_s1 }
  0x2b   :  { %p204_p5 = por %p203_p4, %p202_p3 }
  0x2d   :  { %p205_p6 = pnand %p204_p5, %p198_p2 }
  0xfb   :  { %v118_v4 = vpop.f32.mrb[0].mxu0 }
  0xfc   :  { %v119_v5 = vadd.f32 %v139_v3, %v118_v4  ;;  %v147_v6 = vpop.f32.mrb[1].mxu0 }
  0xfe   :  { %122 = vst [vmem:[#allocation7] sm:$0xff] %v119_v5 }
  0xff   :  { %208 = shalt.err (!%p205_p6)
}
 0x100   :  { %s209_s14 = scalar_lea.hbm %s292_s3, 128 }
 0x101   :  { %p210_p7 = scmp.ne.s32.totalorder %s292_s3, %s209_s14  ;;  %p213_p8 = scmp.lt.u32.totalorder %s209_s14, %s292_s3 }
 0x103   :  { %p215_p9 = pnand %p213_p8, %p210_p7 }
 0x105   :  { %218 = shalt.err (!%p215_p9)
}
 0x106   :  { %132 = dma.vmem_to_hbm [thread:$0]  %s130_s11, 128, %s292_s3, [#allocation4]  }
 0x107   :  { %223 = dma.done.wait [#allocation4], 128  }
 0x108   :  { %224 = vsyncadd [#allocation4], 4294967168 }
 0x109   :  { %136 = vsyncpa [#allocation3], 1 }
 0x10a   :  { %137 = vsyncpa [#allocation6], 1 }
 0x10b   :  { %138 = vsyncpa [#allocation4], 1 }

</bundles_post_ra>
